<compile_context>
chip_gen: v7x
topology: tpu7x:2x2x1
jax: 0.10.0
libtpu: 0.0.40
codegen_flags: <defaults>
</compile_context>

<pallas_src>
import numpy as np
import jax
import jax.numpy as jnp
from jax.experimental import pallas as pl
from jax.experimental.pallas import tpu as pltpu

_EPS = float(np.finfo(np.float32).eps)


# --------------------------- generation-aware tiling --------------------------
def _device_budget():
    """(streaming-buffer byte budget, vmem_limit_bytes or None) per generation."""
    try:
        dev = jax.devices()[0]
        if dev.platform != "tpu":
            return (8 << 20, None)                 # interpret / CPU emulation
        kind = getattr(dev, "device_kind", "").lower()
    except Exception:
        return (8 << 20, None)
    if "v5" in kind:                               # v5e: 16 MiB default scoped VMEM
        return (10 << 20, None)
    if "v6" in kind:                               # v6e: 128 MiB physical -> raise scoped
        return (40 << 20, 64 << 20)
    if "v7" in kind:                               # v7x: 64 MiB physical / 32 MiB scoped per TC
        return (20 << 20, 32 << 20)
    return (12 << 20, None)


def _pick_row_block(R, JD, n_noise_tiles, has_mask):
    """Row block size (multiple of 8) sized against double-buffered VMEM,
    counting the lane-padded (rb, J) mask block as a full 128-lane tile."""
    budget, vmem_limit = _device_budget()
    pad_jd = max(128, -(-JD // 128) * 128)
    per_row = ((2 + n_noise_tiles) * pad_jd + (128 if has_mask else 0)) * 4 * 2
    rb = max(8, (budget // per_row) // 8 * 8)
    if R < 16:
        rb = R                                     # single full block (R == full extent)
    else:
        # Force >= 2 row blocks so the "parallel" grid axis can shard across
        # v7x's two TensorCores (costs ~0.35us extra per step elsewhere).
        half = -(-((R + 1) // 2) // 8) * 8
        rb = min(rb, half)
    return rb, vmem_limit


# ----------------------------- trace-time constants ---------------------------
def _reverse_perm_matrix(J, D):
    """(JD, JD) 0/1 permutation so that (x2 @ P) reverses each D-group of lanes."""
    JD = J * D
    p = np.zeros((JD, JD), np.float32)
    lane = np.arange(JD)
    rev = (lane // D) * D + (D - 1 - (lane % D))
    p[rev, lane] = 1.0
    return jnp.asarray(p)


def _expansion_matrix(J, D, inv_std=None):
    """(J, JD) expansion so that (mask @ E)[r, l] == mask[r, l // D].
    With inv_std given, it is folded in (f32 to keep full precision); otherwise
    the entries are exact 0/1 and the bf16 single-pass MXU path is used."""
    JD = J * D
    e = (np.arange(JD)[None, :] // D == np.arange(J)[:, None]).astype(np.float32)
    if inv_std is None:
        return jnp.asarray(e, dtype=jnp.bfloat16)
    return jnp.asarray(e * np.float32(inv_std))


# --------------------------------- kernels ------------------------------------
def _make_train_kernel(do_reverse, do_noise, do_norm, do_mask, mean, inv_std):
    def kernel(rflag_ref, *refs):
        refs = list(refs)
        x_ref = refs.pop(0)
        noise_ref = refs.pop(0) if do_noise else None
        mask_ref = refs.pop(0) if do_mask else None
        perm_ref = refs.pop(0) if do_reverse else None
        exp_ref = refs.pop(0) if do_mask else None
        o_ref = refs.pop(0)

        def finish(y):
            if do_noise:
                y = y + noise_ref[...]                         # gated noise stream
            if do_norm:
                y = y - mean
                if not do_mask:
                    y = y * inv_std                            # no mask to fold into
            if do_mask:
                m = mask_ref[...]
                if do_norm:
                    # inv_std folded into the f32 expansion matrix (idle MXU,
                    # multi-pass f32 keeps inv_std at full precision).
                    mexp = jnp.dot(m, exp_ref[...],
                                   preferred_element_type=jnp.float32)
                else:
                    # exact 0/1 values -> single-pass bf16 MXU, bit-exact result
                    mexp = jnp.dot(m.astype(jnp.bfloat16), exp_ref[...],
                                   preferred_element_type=jnp.float32)
                y = y * mexp
            o_ref[...] = y.astype(o_ref.dtype)

        if do_reverse:
            # Runtime-gated: the permutation matmul only executes when the
            # per-call Bernoulli draw fired.
            @pl.when(rflag_ref[0] > 0)
            def _():
                finish(jnp.dot(x_ref[...], perm_ref[...],
                               preferred_element_type=jnp.float32))

            @pl.when(rflag_ref[0] == 0)
            def _():
                finish(x_ref[...])
        else:
            finish(x_ref[...])

    return kernel


def _make_eval_kernel(mean, inv_std):
    def kernel(x_ref, o_ref):
        o_ref[...] = (x_ref[...] - mean) * inv_std
    return kernel


# ------------------------------ pallas_call glue -------------------------------
def _train_call(x2, rflags, noise2, mask2, perm, expand, *, stages, mean, inv_std):
    do_reverse, do_noise, do_norm, do_mask = stages
    R, JD = x2.shape
    J = mask2.shape[1] if do_mask else 0
    rb, vmem_limit = _pick_row_block(R, JD, int(do_noise), do_mask)
    grid = (pl.cdiv(R, rb),)

    row = lambda i, rf: (i, 0)
    const = lambda i, rf: (0, 0)        # constants: same block every step (no re-DMA)

    in_specs = [pl.BlockSpec((rb, JD), row)]
    args = [x2]
    if do_noise:
        in_specs.append(pl.BlockSpec((rb, JD), row))
        args.append(noise2)
    if do_mask:
        in_specs.append(pl.BlockSpec((rb, J), row))
        args.append(mask2)
    if do_reverse:
        in_specs.append(pl.BlockSpec((JD, JD), const))
        args.append(perm)
    if do_mask:
        in_specs.append(pl.BlockSpec((J, JD), const))
        args.append(expand)

    kernel = _make_train_kernel(do_reverse, do_noise, do_norm, do_mask, mean, inv_std)
    return pl.pallas_call(
        kernel,
        out_shape=jax.ShapeDtypeStruct((R, JD), jnp.float32),
        grid_spec=pltpu.PrefetchScalarGridSpec(
            num_scalar_prefetch=1,
            grid=grid,
            in_specs=in_specs,
            out_specs=pl.BlockSpec((rb, JD), row),
        ),
        compiler_params=pltpu.CompilerParams(
            dimension_semantics=("parallel",),
            vmem_limit_bytes=vmem_limit,
        ),
    )(rflags, *args)


def _eval_call(x2, mean, inv_std):
    R, JD = x2.shape
    rb, vmem_limit = _pick_row_block(R, JD, 0, False)
    return pl.pallas_call(
        _make_eval_kernel(mean, inv_std),
        out_shape=jax.ShapeDtypeStruct((R, JD), jnp.float32),
        grid_spec=pl.GridSpec(
            grid=(pl.cdiv(R, rb),),
            in_specs=[pl.BlockSpec((rb, JD), lambda i: (i, 0))],
            out_specs=pl.BlockSpec((rb, JD), lambda i: (i, 0)),
        ),
        compiler_params=pltpu.CompilerParams(
            dimension_semantics=("parallel",),
            vmem_limit_bytes=vmem_limit,
        ),
    )(x2)


# --------------------------------- JAX module ----------------------------------
class DataAugmentor:
    def __init__(self, normalize=False, reverse_prob=0.0, snp_noise_prob=0.0,
                 snp_portion=(0.0, 0.0), joint_cutout_prob=0.0,
                 num_joint_cutout=(0, 0), timestep_cutout_prob=0.0,
                 num_timestep_cutout=(0, 0), gaussian_noise_prob=0.0,
                 gaussian_noise_std=0.0):
        self.normalize = normalize
        self.norm_mean = None
        self.norm_var = None
        self.reverse_prob = reverse_prob
        self.snp_noise_prob = snp_noise_prob
        self.snp_portion = snp_portion
        self.joint_cutout_prob = joint_cutout_prob
        self.num_joint_cutout = num_joint_cutout
        self.timestep_cutout_prob = timestep_cutout_prob
        self.num_timestep_cutout = num_timestep_cutout
        self.gaussian_noise_prob = gaussian_noise_prob
        self.gaussian_noise_std = gaussian_noise_std

    def set_mean_var(self, mean, var):
        self.norm_mean = mean
        self.norm_var = var

    def _norm_params(self):
        if self.normalize and self.norm_mean is not None and self.norm_var is not None:
            return float(self.norm_mean), 1.0 / (float(np.sqrt(self.norm_var)) + _EPS)
        return 0.0, 1.0

    # Random-state generation (glue).  torch.randperm / variable-length randint
    # scatter loops are emulated with argsort-ranks and fixed-max-width hit masks.
    def _random_state(self, key, shape):
        B, S, J, D = shape
        L = S * J
        ks = jax.random.split(key, 12)
        rflag = jax.random.uniform(ks[0], ()) < self.reverse_prob      # one draw/call
        gflag = (jax.random.uniform(ks[1], (B,)) < self.gaussian_noise_prob).astype(jnp.int32)
        noise_key = ks[2]

        # _snp_noise: zero a random portion of the S*J joint slots per sequence
        snp_b = jax.random.uniform(ks[3], (B,)) < self.snp_noise_prob
        portion = self.snp_portion[0] + (self.snp_portion[1] - self.snp_portion[0]) \
            * jax.random.uniform(ks[4], (B,))
        portion = jnp.where(snp_b, portion, 0.0)
        k_cut = jnp.floor(portion * L).astype(jnp.int32)
        u = jax.random.uniform(ks[5], (B, L))
        ranks = jnp.argsort(jnp.argsort(u, axis=-1), axis=-1)          # random perm rank
        snp_mask = (ranks >= k_cut[:, None]).astype(jnp.float32).reshape(B, S, J)

        # _joint_noise: zero `num` random joints (with replacement) per sequence
        jb = jax.random.uniform(ks[6], (B,)) < self.joint_cutout_prob
        if self.num_joint_cutout[1] > self.num_joint_cutout[0]:
            num_j = jax.random.randint(ks[7], (B,), self.num_joint_cutout[0],
                                       self.num_joint_cutout[1])
        else:
            num_j = jnp.zeros((B,), jnp.int32)
        max_j = max(self.num_joint_cutout[1] - 1, 1)
        jids = jax.random.randint(ks[8], (B, max_j), 0, J)
        hit_j = ((jids[:, :, None] == jnp.arange(J)[None, None, :]) &
                 (jnp.arange(max_j)[None, :, None] < num_j[:, None, None])).any(axis=1)
        joint_mask = jnp.where(jb[:, None] & hit_j, 0.0, 1.0) \
            .reshape(B, 1, J).astype(jnp.float32)

        # _timestep_noise: zero `num` random timesteps per sequence
        tb = jax.random.uniform(ks[9], (B,)) < self.timestep_cutout_prob
        if self.num_timestep_cutout[1] > self.num_timestep_cutout[0]:
            num_t = jax.random.randint(ks[10], (B,), self.num_timestep_cutout[0],
                                       self.num_timestep_cutout[1])
        else:
            num_t = jnp.zeros((B,), jnp.int32)
        max_t = max(self.num_timestep_cutout[1] - 1, 1)
        tids = jax.random.randint(ks[11], (B, max_t), 0, S)
        hit_t = ((tids[:, :, None] == jnp.arange(S)[None, None, :]) &
                 (jnp.arange(max_t)[None, :, None] < num_t[:, None, None])).any(axis=1)
        ts_mask = jnp.where(tb[:, None] & hit_t, 0.0, 1.0) \
            .reshape(B, S, 1).astype(jnp.float32)

        return rflag, gflag, noise_key, snp_mask, joint_mask, ts_mask

    def __call__(self, x, key, is_train=True):
        B, S, J, D = x.shape
        JD = J * D
        mean, inv_std = self._norm_params()
        do_norm = (self.normalize and self.norm_mean is not None
                   and self.norm_var is not None)

        x = x.astype(jnp.float32)
        if not is_train:
            if not do_norm:
                return x                                   # eval == _blank_processing
            out2 = _eval_call(x.reshape(B * S, JD), mean, inv_std)
            return out2.reshape(B, S, J, D)

        rflag, gflag, noise_key, snp_mask, joint_mask, ts_mask = \
            self._random_state(key, x.shape)

        do_reverse = self.reverse_prob > 0
        do_noise = self.gaussian_noise_prob > 0 and self.gaussian_noise_std > 0
        do_mask = (self.snp_noise_prob > 0 or self.joint_cutout_prob > 0
                   or self.timestep_cutout_prob > 0)

        if not (do_reverse or do_noise or do_norm or do_mask):
            return x                                       # train == _blank_processing

        x2 = x.reshape(B * S, JD)                          # free contiguous reshape
        rflags = jnp.reshape(rflag.astype(jnp.int32), (1,))

        noise2 = None
        if do_noise:
            # per-batch Bernoulli gate * std folded into the generated stream
            scale = gflag.astype(jnp.float32) * self.gaussian_noise_std
            noise2 = (jax.random.normal(noise_key, (B, S, J, D), dtype=jnp.float32)
                      * scale[:, None, None, None]).reshape(B * S, JD)

        mask2 = perm = expand = None
        if do_mask:
            mask2 = (snp_mask * joint_mask * ts_mask).reshape(B * S, J) \
                .astype(jnp.float32)
            expand = _expansion_matrix(J, D, inv_std if do_norm else None)
        if do_reverse:
            perm = _reverse_perm_matrix(J, D)

        out2 = _train_call(x2, rflags, noise2, mask2, perm, expand,
                           stages=(do_reverse, do_noise, do_norm, do_mask),
                           mean=mean, inv_std=inv_std)
        return out2.reshape(B, S, J, D)


# ------------------------------------ main -------------------------------------
if __name__ == "__main__":
    B, S, J, D = 2, 16, 16, 8          # J*D = 128: exactly one lane width
    key = jax.random.PRNGKey(0)
    kx, kaug = jax.random.split(key)
    x = jax.random.normal(kx, (B, S, J, D), dtype=jnp.float32)

    base_kwargs = dict(
        normalize=True, reverse_prob=1.0,
        snp_noise_prob=0.7, snp_portion=(0.1, 0.4),
        joint_cutout_prob=0.5, num_joint_cutout=(1, 4),
        timestep_cutout_prob=0.5, num_timestep_cutout=(1, 3),
        gaussian_noise_prob=1.0,
    )

    # --- Test A: deterministic train path (gaussian std = 0) vs pure-JAX reference
    augA = DataAugmentor(gaussian_noise_std=0.0, **base_kwargs)
    augA.set_mean_var(0.1, 0.9)
    outA = jax.block_until_ready(augA(x, kaug, is_train=True))
    mean, inv_std = augA._norm_params()
    rflag, gflag, _nk, snp, jm, tsm = augA._random_state(kaug, x.shape)
    xr = jnp.where(rflag, jnp.flip(x, axis=-1), x)
    mask4 = (snp * jm * tsm)[..., None]
    refA = ((xr - mean) * inv_std) * mask4
    np.testing.assert_allclose(np.asarray(outA), np.asarray(refA), rtol=1e-5, atol=1e-5)

    # --- Test B: eval pipeline (normalize only)
    outB = jax.block_until_ready(augA(x, kaug, is_train=False))
    refB = (x - mean) * inv_std
    np.testing.assert_allclose(np.asarray(outB), np.asarray(refB), rtol=1e-5, atol=1e-5)

    # --- Test C: stochastic path (per-batch-gated gaussian noise stream)
    std = 0.02
    augC = DataAugmentor(gaussian_noise_std=std, **base_kwargs)
    augC.set_mean_var(0.1, 0.9)
    outC = np.asarray(jax.block_until_ready(augC(x, kaug, is_train=True)))
    mask_np = np.broadcast_to(np.asarray(mask4), outC.shape)
    assert np.all(np.isfinite(outC))
    assert np.all(outC[mask_np == 0.0] == 0.0)             # cutouts still exact zeros
    diff = np.abs(outC - np.asarray(refA))
    keep = mask_np != 0.0
    assert diff[keep].max() <= 8.0 * std * inv_std + 1e-5   # noise bounded (~8 sigma)
    assert diff[keep].max() > 0.0                           # noise really was added

    # --- Test D: reverse-only path with non-power-of-two joint_dim (D = 6)
    augD = DataAugmentor(normalize=False, reverse_prob=1.0)
    xD = jax.random.normal(jax.random.PRNGKey(3), (2, 8, 16, 6), dtype=jnp.float32)
    outD = jax.block_until_ready(augD(xD, jax.random.PRNGKey(4), is_train=True))
    np.testing.assert_allclose(np.asarray(outD), np.asarray(jnp.flip(xD, -1)),
                               rtol=1e-5, atol=1e-5)

    # --- Test E: cutout-only path (exact 0/1 bf16 MXU mask expansion)
    augE = DataAugmentor(joint_cutout_prob=1.0, num_joint_cutout=(1, 4))
    kE = jax.random.PRNGKey(7)
    outE = jax.block_until_ready(augE(x, kE, is_train=True))
    _, _, _, snpE, jmE, tsmE = augE._random_state(kE, x.shape)
    refE = x * ((snpE * jmE * tsmE)[..., None])
    np.testing.assert_allclose(np.asarray(outE), np.asarray(refE), rtol=1e-6, atol=1e-6)

    print("KERNEL_OK")
</pallas_src>

<mosaic_0001>
module attributes {stable_mosaic.version = 11 : i64} {
  func.func @kernel(%arg0: i32, %arg1: memref<1xi32, #tpu.memory_space<smem>>, %arg2: memref<16x128xf32, #tpu.memory_space<vmem>>, %arg3: memref<16x16xf32, #tpu.memory_space<vmem>>, %arg4: memref<128x128xf32, #tpu.memory_space<vmem>>, %arg5: memref<16x128xf32, #tpu.memory_space<vmem>>, %arg6: memref<16x128xf32, #tpu.memory_space<vmem>>) attributes {dimension_semantics = [#tpu.dimension_semantics<parallel>], iteration_bounds = array<i64: 2>, scalar_prefetch = 1 : i64, scratch_operands = 0 : i64, tpu.core_type = #tpu.core_type<tc>, window_params = [{transform_indices = @transform_0, window_bounds = array<i64: 16, 128>}, {transform_indices = @transform_1, window_bounds = array<i64: 16, 16>}, {pipeline_mode = #tpu.pipeline_mode<synchronous>, transform_indices = @transform_2, window_bounds = array<i64: 128, 128>}, {pipeline_mode = #tpu.pipeline_mode<synchronous>, transform_indices = @transform_3, window_bounds = array<i64: 16, 128>}, {transform_indices = @transform_4, window_bounds = array<i64: 16, 128>}]} {
    %c0 = arith.constant 0 : index
    %0 = memref.load %arg1[%c0] : memref<1xi32, #tpu.memory_space<smem>>
    %c0_i32 = arith.constant 0 : i32
    %1 = arith.cmpi sgt, %0, %c0_i32 : i32
    %2 = arith.extui %1 : i1 to i32
    %c0_i32_0 = arith.constant 0 : i32
    %3 = arith.cmpi ne, %2, %c0_i32_0 : i32
    scf.if %3 {
      %c0_4 = arith.constant 0 : index
      %c0_5 = arith.constant 0 : index
      %8 = vector.load %arg2[%c0_4, %c0_5] : memref<16x128xf32, #tpu.memory_space<vmem>>, vector<16x128xf32>
      %c0_6 = arith.constant 0 : index
      %c0_7 = arith.constant 0 : index
      %9 = vector.load %arg4[%c0_6, %c0_7] : memref<128x128xf32, #tpu.memory_space<vmem>>, vector<128x128xf32>
      %cst = arith.constant dense<0.000000e+00> : vector<16x128xf32>
      %10 = tpu.matmul %8, %9, %cst {dimension_numbers = #tpu.dot_dimension_numbers<[1], [0], [0], [1], [0, 0, 1, 1], [], []>} : vector<16x128xf32>, vector<128x128xf32>, vector<16x128xf32> -> vector<16x128xf32>
      %cst_8 = arith.constant 1.000000e-01 : f32
      %11 = vector.broadcast %cst_8 : f32 to vector<16x128xf32>
      %12 = arith.subf %10, %11 : vector<16x128xf32>
      %c0_9 = arith.constant 0 : index
      %c0_10 = arith.constant 0 : index
      %13 = vector.load %arg3[%c0_9, %c0_10] : memref<16x16xf32, #tpu.memory_space<vmem>>, vector<16x16xf32>
      %c0_11 = arith.constant 0 : index
      %c0_12 = arith.constant 0 : index
      %14 = vector.load %arg5[%c0_11, %c0_12] : memref<16x128xf32, #tpu.memory_space<vmem>>, vector<16x128xf32>
      %cst_13 = arith.constant dense<0.000000e+00> : vector<16x128xf32>
      %15 = tpu.matmul %13, %14, %cst_13 {dimension_numbers = #tpu.dot_dimension_numbers<[1], [0], [0], [1], [0, 0, 1, 1], [], []>} : vector<16x16xf32>, vector<16x128xf32>, vector<16x128xf32> -> vector<16x128xf32>
      %16 = arith.mulf %12, %15 : vector<16x128xf32>
      %c0_14 = arith.constant 0 : index
      %c0_15 = arith.constant 0 : index
      %17 = vector.load %arg6[%c0_14, %c0_15] : memref<16x128xf32, #tpu.memory_space<vmem>>, vector<16x128xf32>
      tpu.vector_store %arg6[%c0_14, %c0_15], %16 {strides = array<i32>} : memref<16x128xf32, #tpu.memory_space<vmem>>, vector<16x128xf32>,
    } else {
    }
    %c0_1 = arith.constant 0 : index
    %4 = memref.load %arg1[%c0_1] : memref<1xi32, #tpu.memory_space<smem>>
    %c0_i32_2 = arith.constant 0 : i32
    %5 = arith.cmpi eq, %4, %c0_i32_2 : i32
    %6 = arith.extui %5 : i1 to i32
    %c0_i32_3 = arith.constant 0 : i32
    %7 = arith.cmpi ne, %6, %c0_i32_3 : i32
    scf.if %7 {
      %c0_4 = arith.constant 0 : index
      %c0_5 = arith.constant 0 : index
      %8 = vector.load %arg2[%c0_4, %c0_5] : memref<16x128xf32, #tpu.memory_space<vmem>>, vector<16x128xf32>
      %cst = arith.constant 1.000000e-01 : f32
      %9 = vector.broadcast %cst : f32 to vector<16x128xf32>
      %10 = arith.subf %8, %9 : vector<16x128xf32>
      %c0_6 = arith.constant 0 : index
      %c0_7 = arith.constant 0 : index
      %11 = vector.load %arg3[%c0_6, %c0_7] : memref<16x16xf32, #tpu.memory_space<vmem>>, vector<16x16xf32>
      %c0_8 = arith.constant 0 : index
      %c0_9 = arith.constant 0 : index
      %12 = vector.load %arg5[%c0_8, %c0_9] : memref<16x128xf32, #tpu.memory_space<vmem>>, vector<16x128xf32>
      %cst_10 = arith.constant dense<0.000000e+00> : vector<16x128xf32>
      %13 = tpu.matmul %11, %12, %cst_10 {dimension_numbers = #tpu.dot_dimension_numbers<[1], [0], [0], [1], [0, 0, 1, 1], [], []>} : vector<16x16xf32>, vector<16x128xf32>, vector<16x128xf32> -> vector<16x128xf32>
      %14 = arith.mulf %10, %13 : vector<16x128xf32>
      %c0_11 = arith.constant 0 : index
      %c0_12 = arith.constant 0 : index
      %15 = vector.load %arg6[%c0_11, %c0_12] : memref<16x128xf32, #tpu.memory_space<vmem>>, vector<16x128xf32>
      tpu.vector_store %arg6[%c0_11, %c0_12], %14 {strides = array<i32>} : memref<16x128xf32, #tpu.memory_space<vmem>>, vector<16x128xf32>,
    } else {
    }
    return
  }
  func.func @transform_0(%arg0: i32, %arg1: memref<1xi32, #tpu.memory_space<smem>>) -> (i32, i32) {
    %c0_i32 = arith.constant 0 : i32
    %c0_i32_0 = arith.constant 0 : i32
    return %arg0, %c0_i32 : i32, i32
  }
  func.func @transform_1(%arg0: i32, %arg1: memref<1xi32, #tpu.memory_space<smem>>) -> (i32, i32) {
    %c0_i32 = arith.constant 0 : i32
    %c0_i32_0 = arith.constant 0 : i32
    return %arg0, %c0_i32 : i32, i32
  }
  func.func @transform_2(%arg0: i32, %arg1: memref<1xi32, #tpu.memory_space<smem>>) -> (i32, i32) {
    %c0_i32 = arith.constant 0 : i32
    %c0_i32_0 = arith.constant 0 : i32
    %c0_i32_1 = arith.constant 0 : i32
    return %c0_i32, %c0_i32_0 : i32, i32
  }
  func.func @transform_3(%arg0: i32, %arg1: memref<1xi32, #tpu.memory_space<smem>>) -> (i32, i32) {
    %c0_i32 = arith.constant 0 : i32
    %c0_i32_0 = arith.constant 0 : i32
    %c0_i32_1 = arith.constant 0 : i32
    return %c0_i32, %c0_i32_0 : i32, i32
  }
  func.func @transform_4(%arg0: i32, %arg1: memref<1xi32, #tpu.memory_space<smem>>) -> (i32, i32) {
    %c0_i32 = arith.constant 0 : i32
    %c0_i32_0 = arith.constant 0 : i32
    return %arg0, %c0_i32 : i32, i32
  }
}

</mosaic_0001>

<bundles_post_ra>
// kernel: tpu_custom_call.1
= control target key start
LH: loop header
LB: loop body
LE: loop exit
PB: predicated region body
PF: predicated region fallthrough
CT: control target
= control target key end

     0   :  { %s1135_s0 = inlined_call_operand.<no memory space> [shape: s32[1], index: 0, kind: input, shape index: {}]   ;;  %s1136_s1 = inlined_call_operand.vmem [shape: f32[32,128], index: 1, kind: input, shape index: {}]   ;;  %s1137_s2 = inlined_call_operand.vmem [shape: f32[32,16], index: 2, kind: input, shape index: {}]   ;;  %s1138_s3 = inlined_call_operand.hbm [shape: f32[128,128], index: 3, kind: input, shape index: {}]   ;;  %s1139_s4 = inlined_call_operand.vmem [shape: f32[16,128], index: 4, kind: input, shape index: {}]   ;;  %s1140_s5 = inlined_call_operand.hbm [shape: f32[32,128], index: 5, kind: output, shape index: {}]  }
   0x1   :  { %10 = sst [smem:[#allocation3]] %s1135_s0 }
   0x2   :  { %11 = vsyncpa [#allocation5], 0 }
   0x3   :  { %12 = vsyncpa [#allocation6], 0 }
   0x4   :  { %14 = vsyncpa [#allocation6 + $0x1], 0  ;;  %s958_s20 = smov 0   ;;  %s960_s21 = smov 0  }
   0x5   :  { %s962_s22 = smov 0   ;;  %s964_s23 = smov 0  }
   0x6 LB: > { %s979_s0 = sadd.s32 4294967295, %s917_s23   ;;  %s627_s24 = sadd.s32 4294967294, %s917_s23   ;;  %s917_s23 = sphi %s964_s23, %s1156_s23   ;;  %s913_s22 = sphi %s962_s22, %s1155_s22   ;;  %s909_s21 = sphi %s960_s21, %s1154_s21   ;;  %s905_s20 = sphi %s958_s20, %s1153_s20  }
   0x7   : > { %s983_s25 = sadd.s32 1, %s917_s23   ;;  %s121_s26 = sadd.s32 1, %s913_s22 }
   0x8   : > { %s118_s27 = ssub.s32 %s917_s23, %s983_s25  ;;  %p131_p0 = scmp.ne.s32.totalorder %s913_s22, %s909_s21 }
   0x9   : > { %p119_p1 = scmp.eq.s32.totalorder %s118_s27, 0  ;;  %p132_p2 = scmp.eq.s32.totalorder %s979_s0, 1 }
   0xa   : > { %p137_p3 = scmp.ne.s32.totalorder %s909_s21, %s905_s20  ;;  %p138_p4 = scmp.eq.s32.totalorder %s627_s24, 1 }
   0xb   : > { %s994_s28 = scalar_select %p119_p1, %s913_s22, %s121_s26  }
   0xc   : > { %p996_p5 = por %p132_p2, %p131_p0  ;;  %p1000_p6 = por %p138_p4, %p137_p3 }
   0xd   : > { %p628_p7 = scmp.ge.s32.totalorder %s917_s23, 1  ;;  %p145_p8 = scmp.lt.s32.totalorder %s917_s23, 3 }
   0xe   : > { %s1144_s29 = scalar_select %p996_p5, 1, 0 }
   0xf   : > { %s1145_s30 = scalar_select %p1000_p6, 1, 0 }
  0x10   : > { %p1141_p9 = scmp.eq.s32.totalorder %s979_s0, 0  ;;  %p1007_p10 = pnand %p628_p7, %p145_p8 }
  0x11   : > { %s919_s7 = smov [#allocation4]   ;;  %s823_s12 = scalar_lea.hbm %s1138_s3, 2048 }
  0x12   : > { %s1146_s6 = scalar_select %p1007_p10, 1, 0 }
  0x13   : > { %s157_s8 = sshll.u32 %s919_s7, 4  ;;  %p775_p11 = pneg %p1007_p10  ;;  %s158_s8 = int_to_ptr.vmem [resolvable:$true] %s157_s8 }
  0x14   : > { %p824_p13 = scmp.ne.s32.totalorder %s1138_s3, %s823_s12  ;;  %p830_p3 = scmp.lt.u32.totalorder %s823_s12, %s1138_s3 }
  0x15   : > { %p1015_p12 = pnand %p1141_p9, %p775_p11 }
  0x17   : > { %p825_p0 = pneg %p1015_p12 }
  0x19   : > { %p826_p1 = pnand %p825_p0, %p824_p13 }
  0x1b   : > { %p827_p2 = pneg %p826_p1 }
  0x1d   : > { %p832_p4 = pnand %p830_p3, %p827_p2 }
  0x1f   : > { %835 = shalt.err (!%p832_p4)
}
  0x20   : > { %s836_s17 = scalar_lea.vmem %s158_s8, 2048  ;;  %p844_p9 = scmp.lt.s32.totalorder %s158_s8, %s158_s8 }
  0x21   : > { %p837_p7 = scmp.ne.s32.totalorder %s158_s8, %s836_s17  ;;  %p845_p6 = scmp.lt.s32.totalorder %s836_s17, %s836_s17 }
  0x23   : > { %p839_p8 = pnand %p837_p7, %p825_p0  ;;  %p846_p5 = por %p845_p6, %p844_p9 }
  0x25   : > { %p840_p11 = pneg %p839_p8 }
  0x27   : > { %p847_p10 = pnand %p846_p5, %p840_p11 }
  0x29   : > { %850 = shalt.err (!%p847_p10)
}
  0x2a   : > { %s920_s18 = smov 128   ;;  %s921_s19 = smov 8  }
  0x2b   : > { %778 = dma.hbm_to_vmem [thread:$0]  (!%p1015_p12), %s1138_s3, 2048, %s158_s8, [#allocation5], %s920_s18, %s920_s18, %s921_s19  }
  0x2c   : > { %p1148_p13 = scmp.ne.s32.totalorder %s1146_s6, 0 }
  0x2d   : > { %p1149_p1 = scmp.eq.s32.totalorder (!%p1148_p13), %s979_s0, 0 }
  0x2e   : > { %194 = sbr.rel (%p1148_p13) target bundleno = 571 (0x23b), region = 36 }
  0x35   : > { %896 = dma.done.wait (%p1149_p1), [#allocation5], 2048   ;;  %p1150_p0 = pmov %p1149_p1 }
  0x36   : > { %s222_s27 = sand.u32 1, %s909_s21   ;;  %s634_s7 = sshll.u32 %s979_s0, 1 }
  0x37   : > { %898 = vsyncadd (%p1150_p0), [#allocation5], 4294965248  ;;  %s238_s10 = sld [smem:[#allocation3]]  ;;  %s633_s9 = sshll.u32 %s222_s27, 4 }
  0x38   : > { %p226_p5 = scmp.lt.s32.totalorder %s634_s7, 3  ;;  %s1055_s16 = scalar_lea.vmem [#allocation7], %s633_s9 }
  0x3a   : > { %s1158_s7 = smov (!%p226_p5, %s634_s7), 3 }
  0x3b   : > { %s635_s8 = sshll.u32 %s1158_s7, 3 }
  0x3c   : > { %s1048_s12 = scalar_lea.vmem %s1136_s1, %s635_s8  ;;  %s1053_s15 = scalar_lea.vmem %s1137_s2, %s635_s8 }
  0x3d   : > { %p638_p6 = scmp.le.s32.totalorder %s238_s10, 0 }
  0x3e   : > { %v245_v0 = vld [vmem:[#allocation4] sm:$0xff] (!%p638_p6)  ;;  %v246_v1 = vld [vmem:[#allocation4 + $0x8] sm:$0xff] (!%p638_p6)  ;;  %v247_v2 = vld [vmem:[#allocation4 + $0x10] sm:$0xff] (!%p638_p6)  ;;  %vm342_vm0 = vcmask (!%p638_p6), 130048  }
  0x3f   : > { %242 = sbr.rel (%p638_p6) target bundleno = 315 (0x13b), region = 44  ;;  %v729_v3 = vpack.c.bf16 (!%p638_p6), %v246_v1, %v245_v0  ;;  %v248_v4 = vld [vmem:[#allocation4 + $0x18] sm:$0xff] (!%p638_p6)  ;;  %v249_v6 = vld [vmem:[#allocation4 + $0x20] sm:$0xff] (!%p638_p6)  ;;  %v250_v7 = vld [vmem:[#allocation4 + $0x28] sm:$0xff] (!%p638_p6) }
  0x40   : > { %v733_v5 = vpack.c.bf16 (!%p638_p6), %v248_v4, %v247_v2  ;;  %v737_v8 = vpack.c.bf16 (!%p638_p6), %v250_v7, %v249_v6  ;;  %v251_v9 = vld [vmem:[#allocation4 + $0x30] sm:$0xff] (!%p638_p6)  ;;  %v340_v10 = vld [vmem:[%s1139_s4] sm:$0xff] (!%p638_p6)  ;;  %v341_v11 = vld [vmem:[%s1139_s4 + $0x8] sm:$0xff] (!%p638_p6) }
  0x41   : > { %730 = vmatprep.subr.bf16.mxu0 (!%p638_p6), %v729_v3  ;;  %v252_v12 = vld [vmem:[#allocation4 + $0x38] sm:$0xff] (!%p638_p6)  ;;  %v761_v13 = vpack.c.bf16 (!%p638_p6), %v341_v11, %v340_v10  ;;  %v243_v14 = vld [vmem:[%s1048_s12] sm:$0xff] (!%p638_p6)  ;;  %v339_v17 = vld [vmem:[%s1053_s15 + $0x8] sm:$0xff] (!%p638_p6) }
  0x42   : > { %732 = vmatpush3.bf16.msra.mxu0 (!%p638_p6), %v729_v3  ;;  %v338_v15 = vld [vmem:[%s1053_s15] sm:$0xff] (!%p638_p6)  ;;  %712 = vmatprep.mubr.f32.mxu0 (!%p638_p6), %v243_v14  ;;  %v741_v16 = vpack.c.bf16 (!%p638_p6), %v252_v12, %v251_v9  ;;  %v254_v19 = vld [vmem:[#allocation4 + $0x48] sm:$0xff] (!%p638_p6)  ;;  %v255_v21 = vld [vmem:[#allocation4 + $0x50] sm:$0xff] (!%p638_p6) }
  0x43   : > { %734 = vmatprep.subr.bf16.mxu0 (!%p638_p6), %v733_v5  ;;  %719 = vmatprep.mubr.msk.f32.mxu1 (!%p638_p6), %vm342_vm0, %v338_v15  ;;  %v253_v18 = vld [vmem:[#allocation4 + $0x40] sm:$0xff] (!%p638_p6)  ;;  %v256_v22 = vld [vmem:[#allocation4 + $0x58] sm:$0xff] (!%p638_p6)  ;;  %v258_v25 = vld [vmem:[#allocation4 + $0x68] sm:$0xff] (!%p638_p6) }
  0x44   : > { %762 = vmatprep.subr.bf16.mxu1 (!%p638_p6), %v761_v13  ;;  %v745_v20 = vpack.c.bf16 (!%p638_p6), %v254_v19, %v253_v18  ;;  %v749_v23 = vpack.c.bf16 (!%p638_p6), %v256_v22, %v255_v21  ;;  %v257_v24 = vld [vmem:[#allocation4 + $0x60] sm:$0xff] (!%p638_p6)  ;;  %v259_v27 = vld [vmem:[#allocation4 + $0x70] sm:$0xff] (!%p638_p6)  ;;  %v260_v28 = vld [vmem:[#allocation4 + $0x78] sm:$0xff] (!%p638_p6) }
  0x45   : > { %764 = vmatpush3.bf16.msra.mxu1 (!%p638_p6), %v761_v13  ;;  %v753_v26 = vpack.c.bf16 (!%p638_p6), %v258_v25, %v257_v24  ;;  %v757_v29 = vpack.c.bf16 (!%p638_p6), %v260_v28, %v259_v27  ;;  %v244_v30 = vld [vmem:[%s1048_s12 + $0x8] sm:$0xff] (!%p638_p6) }
  0x46   : > { %736 = vmatpush3.bf16.msra.mxu0 %v733_v5 }
  0x47   : > { %738 = vmatprep.subr.bf16.mxu0 %v737_v8 }
  0x48   : > { %720 = vmatmul.mubr.msk.f32.vlgmr.msra.gmra.mrb[0].mxu1 %vm342_vm0, %v339_v17 }
  0x4a   : > { %740 = vmatpush3.bf16.msra.mxu0 %v737_v8 }
  0x4b   : > { %742 = vmatprep.subr.bf16.mxu0 %v741_v16 }
  0x4e   : > { %744 = vmatpush3.bf16.msra.mxu0 %v741_v16 }
  0x4f   : > { %746 = vmatprep.subr.bf16.mxu0 %v745_v20 }
  0x52   : > { %748 = vmatpush3.bf16.msra.mxu0 %v745_v20 }
  0x53   : > { %750 = vmatprep.subr.bf16.mxu0 %v749_v23 }
  0x56   : > { %752 = vmatpush3.bf16.msra.mxu0 %v749_v23 }
  0x57   : > { %754 = vmatprep.subr.bf16.mxu0 %v753_v26 }
  0x5a   : > { %756 = vmatpush3.bf16.msra.mxu0 %v753_v26 }
  0x5b   : > { %758 = vmatprep.subr.bf16.mxu0 %v757_v29 }
  0x5e   : > { %760 = vmatpush3.bf16.msra.mxu0 %v757_v29 }
  0x61   : > { %713 = vmatmul.mubr.f32.vlgmr.msra.gmra.mrb[0].mxu0 %v244_v30 }
 0x11b   : > { %v721_v31 = vpop.f32.mrb[0].mxu1 }
 0x11c   : > { %v415_v32 = vpop.f32.mrb[1].mxu1 }
 0x134   : > { %v714_v33 = vpop.f32.mrb[0].mxu0 }
 0x135   : > { %v640_v34 = vadd.f32 -0.1, %v714_v33  ;;  %v327_v35 = vpop.f32.mrb[1].mxu0 }
 0x136   : > { %v639_v36 = vadd.f32 -0.1, %v327_v35 }
 0x137   : > { %v425_v37 = vmul.f32 %v721_v31, %v640_v34 }
 0x138   : > { %v424_v38 = vmul.f32 %v639_v36, %v415_v32 }
 0x139   : > { %427 = vst [vmem:[%s1055_s16 + $0x8] sm:$0xff] %v425_v37 }
 0x13a   : > { %426 = vst [vmem:[%s1055_s16] sm:$0xff] %v424_v38 }
 0x13b PF: > { %s428_s26 = sld [smem:[#allocation3]] }
 0x141   : > { %p643_p9 = scmp.ne.s32.totalorder %s428_s26, 0 }
 0x142   : > { %v439_v39 = vld [vmem:[%s1139_s4] sm:$0xff] (!%p643_p9)  ;;  %v440_v40 = vld [vmem:[%s1139_s4 + $0x8] sm:$0xff] (!%p643_p9)  ;;  %vm441_vm1 = vcmask (!%p643_p9), 130048  }
 0x143   : > { %432 = sbr.rel (%p643_p9) target bundleno = 545 (0x221), region = 48  ;;  %v437_v41 = vld [vmem:[%s1053_s15] sm:$0xff] (!%p643_p9)  ;;  %v765_v42 = vpack.c.bf16 (!%p643_p9), %v440_v40, %v439_v39  ;;  %v438_v43 = vld [vmem:[%s1053_s15 + $0x8] sm:$0xff] (!%p643_p9) }
 0x144   : > { %726 = vmatprep.mubr.msk.f32.mxu0 (!%p643_p9), %vm441_vm1, %v437_v41  ;;  %v434_v44 = vld [vmem:[%s1048_s12 + $0x8] sm:$0xff] (!%p643_p9)  ;;  %v433_v45 = vld [vmem:[%s1048_s12] sm:$0xff] (!%p643_p9) }
 0x145   : > { %766 = vmatprep.subr.bf16.mxu0 (!%p643_p9), %v765_v42  ;;  %v645_v46 = vadd.f32 (!%p643_p9), -0.1, %v434_v44  ;;  %v644_v47 = vadd.f32 (!%p643_p9), -0.1, %v433_v45 }
 0x146   : > { %768 = vmatpush3.bf16.msra.mxu0 (!%p643_p9), %v765_v42 }
 0x149   : > { %727 = vmatmul.mubr.msk.f32.vlgmr.msra.gmra.mrb[0].mxu0 (!%p643_p9), %vm441_vm1, %v438_v43 }
 0x21c   : > { %v728_v48 = vpop.f32.mrb[0].mxu0 }
 0x21d   : > { %v524_v49 = vmul.f32 %v728_v48, %v645_v46  ;;  %v514_v50 = vpop.f32.mrb[1].mxu0 }
 0x21e   : > { %v523_v51 = vmul.f32 %v644_v47, %v514_v50 }
 0x21f   : > { %526 = vst [vmem:[%s1055_s16 + $0x8] sm:$0xff] %v524_v49 }
 0x220   : > { %525 = vst [vmem:[%s1055_s16] sm:$0xff] %v523_v51 }
 0x221 PF: > { %s653_s11 = sshll.u32 %s979_s0, 8  ;;  %s541_s12 = sshll.u32 %s1055_s16, 4  ;;  %s1090_s12 = int_to_ptr.vmem [resolvable:$true] %s541_s12 }
 0x222   : > { %s1087_s14 = scalar_lea.hbm %s1140_s5, %s653_s11  ;;  %s1094_s15 = scalar_lea.sflag [#allocation6], %s222_s27 }
 0x223   : > { %s851_s17 = scalar_lea.vmem %s1090_s12, 256  ;;  %p1151_p12 = scmp.ne.s32.totalorder %s1144_s29, 0 }
 0x224   : > { %p852_p10 = scmp.ne.s32.totalorder %s1090_s12, %s851_s17  ;;  %s922_s0 = smov [#allocation7]  }
 0x225   : > { %s855_s18 = sshll.u32 %s922_s0, 4  ;;  %s856_s18 = int_to_ptr.vmem [resolvable:$false] %s855_s18 }
 0x226   : > { %p853_p2 = pnand %p852_p10, %p1151_p12  ;;  %s857_s19 = scalar_lea.vmem %s856_s18, 512 }
 0x227   : > { %p858_p4 = scmp.lt.s32.totalorder %s1090_s12, %s856_s18  ;;  %p859_p7 = scmp.lt.s32.totalorder %s857_s19, %s851_s17 }
 0x228   : > { %p854_p3 = pneg %p853_p2 }
 0x229   : > { %p860_p8 = por %p859_p7, %p858_p4 }
 0x22b   : > { %p861_p11 = pnand %p860_p8, %p854_p3 }
 0x22d   : > { %864 = shalt.err (!%p861_p11)
}
 0x22e   : > { %s865_s27 = scalar_lea.hbm %s1087_s14, 256  ;;  %s869_s26 = scalar_lea.hbm %s1140_s5, 512 }
 0x22f   : > { %p866_p13 = scmp.ne.s32.totalorder %s1087_s14, %s865_s27  ;;  %p870_p5 = scmp.lt.u32.totalorder %s1087_s14, %s1140_s5 }
 0x230   : > { %p871_p6 = scmp.lt.u32.totalorder %s869_s26, %s865_s27  ;;  %p873_p10 = scmp.lt.u32.totalorder %s865_s27, %s1087_s14 }
 0x231   : > { %p867_p1 = pnand %p866_p13, %p1151_p12 }
 0x232   : > { %p872_p9 = por %p871_p6, %p870_p5 }
 0x233   : > { %p868_p0 = pneg %p867_p1 }
 0x234   : > { %p874_p2 = por %p873_p10, %p872_p9 }
 0x236   : > { %p875_p3 = pnand %p874_p2, %p868_p0 }
 0x238   : > { %878 = shalt.err (!%p875_p3)
}
 0x239   : > { %s923_s9 = smov 128   ;;  %s924_s8 = smov 8  }
 0x23a   : > { %773 = dma.vmem_to_hbm [thread:$0]  (%p1151_p12), %s1090_s12, 256, %s1087_s14, %s1094_s15, %s923_s9, %s923_s9, %s924_s8  }
 0x23b PF: > { %p785_p4 = scmp.ge.s32.totalorder %s917_s23, 2  ;;  %s556_s11 = sand.u32 1, %s905_s20  }
 0x23c   : > { %p1152_p7 = scmp.ne.s32.totalorder %s1145_s30, 0  ;;  %s557_s6 = scalar_lea.sflag [#allocation6], %s556_s11 }
 0x23e   : > { %p780_p8 = pnand %p785_p4, %p1152_p7 }
 0x240   : > { %900 = dma.done.wait (!%p780_p8), %s557_s6, 256  }
 0x241   : > { %902 = vsyncadd (!%p780_p8), %s557_s6, 4294967040  ;;  %p17_p11 = scmp.ge.s32.totalorder %s983_s25, 4   ;;  %s1153_s20 = smov %s909_s21 }
 0x242   : > { %s1154_s21 = smov %s913_s22  ;;  %s1155_s22 = smov %s994_s28 }
 0x243   : > { %s1156_s23 = smov %s983_s25  ;;  %19 = sbr.rel (!%p17_p11) target bundleno = 6 (0x6), region = 87 }
 0x24a   :  { %562 = vsyncpa [#allocation5], 1 }
 0x24b   :  { %564 = vsyncpa [#allocation5 + $0x1], 1 }
 0x24c   :  { %565 = vsyncpa [#allocation6], 1 }
 0x24d   :  { %567 = vsyncpa [#allocation6 + $0x1], 1 }

</bundles_post_ra>
